<compile_context>
chip_gen: v5e
topology: v5e:2x2
jax: 0.10.0
libtpu: 0.0.40
codegen_flags: <defaults>
</compile_context>

<pallas_src>
from functools import partial

import jax
import jax.numpy as jnp
from jax.experimental import pallas as pl
from jax.experimental.pallas import tpu as pltpu

LAMBDA_COORD = 5.0
LAMBDA_NOOBJ = 0.5
NOISE = 1e-6

VMEM_INPUT_BUDGET = 24 << 20   # double-buffered input tiles; safe on v5e/v6e/v7x
MIN_PALLAS_BYTES = 1 << 20     # below this, a fused XLA reduction is faster


def _yolo_loss_kernel(pred_ref, tgt_ref, out_ref, *, n_valid: int):
    # pred_ref / tgt_ref: (D, TILE_N) native-dtype VMEM tiles
    #                     (features on sublanes, grid cells on lanes).
    # out_ref: (3, TILE_N) f32 accumulator resident across the reduction grid:
    #          rows = box / obj+noobj / class per-lane partial sums.
    tile_n = pred_ref.shape[1]

    @pl.when(pl.program_id(0) == 0)
    def _init():
        out_ref[...] = jnp.zeros_like(out_ref)

    pred = pred_ref[...].astype(jnp.float32)                   # (D, TN)
    tgt = tgt_ref[...].astype(jnp.float32)
    d_feat = pred.shape[0]

    # Lane validity: the last block may extend past the real cell count.
    lane = pl.program_id(0) * tile_n + jax.lax.broadcasted_iota(
        jnp.int32, (1, tile_n), 1)
    valid = lane < n_valid                                     # (1, TN) bool

    conf_t = tgt[4:5, :]                                       # target objectness
    obj_b = conf_t == 1.0
    obj = obj_b.astype(jnp.float32)
    noobj = (conf_t == 0.0).astype(jnp.float32)

    # Squared diffs once over the full tile; static per-sublane row masks.
    diff = pred - tgt
    sq = diff * diff                                           # (D, TN)
    row = jax.lax.broadcasted_iota(jnp.int32, (d_feat, 1), 0)  # (D, 1)

    # --- box loss: xy in raw space, wh in sqrt space (object cells only) ----
    sse_xy = jnp.sum(jnp.where(row < 2, sq, 0.0), axis=0, keepdims=True)
    d_wh = jnp.where(
        obj_b,
        jnp.sqrt(pred[2:4, :] + NOISE) - jnp.sqrt(tgt[2:4, :]),
        0.0,
    )
    sse_wh = jnp.sum(d_wh * d_wh, axis=0, keepdims=True)
    box_lane = LAMBDA_COORD * (obj * sse_xy + sse_wh)          # (1, TN)

    # --- objectness loss: fused obj + lambda_noobj * noobj weight -----------
    objnoobj_lane = (obj + LAMBDA_NOOBJ * noobj) * sq[4:5, :]  # (1, TN)

    # --- class loss (rows 5..D-1), object cells only -------------------------
    cls_lane = obj * jnp.sum(jnp.where(row >= 5, sq, 0.0), axis=0, keepdims=True)

    # Padded lanes (any garbage the ragged DMA brought in, even NaN/Inf) are
    # dropped by the select before accumulation.
    zero = jnp.zeros_like(box_lane)
    out_ref[0:1, :] += jnp.where(valid, box_lane, zero)
    out_ref[1:2, :] += jnp.where(valid, objnoobj_lane, zero)
    out_ref[2:3, :] += jnp.where(valid, cls_lane, zero)


def _yolo_loss_pallas(prediction, targets, *, max_tile_n=None):
    B, S1, S2, D = prediction.shape
    assert D >= 5, "YOLO grid needs at least (x, y, w, h, conf) channels"
    N = B * S1 * S2
    p_item = prediction.dtype.itemsize
    t_item = targets.dtype.itemsize

    # Lane-dense layout: features on sublanes, cells on lanes.
    # One fused reshape+transpose per input; no feature padding, no cell
    # padding (the ragged last block is masked in-kernel).
    pred_t = prediction.reshape(N, D).T                        # (D, N)
    tgt_t = targets.reshape(N, D).T

    n_arr = N
    if N < 128:  # degenerate tiny case: pad lanes up to one block (cheap)
        pad = 128 - N
        pred_t = jnp.pad(pred_t, ((0, 0), (0, pad)))
        tgt_t = jnp.pad(tgt_t, ((0, 0), (0, pad)))
        n_arr = 128

    # Tile size from the VMEM budget (2 inputs x 2 pipeline buffers), rounded
    # to a lane multiple of 128 and capped so blocks never exceed the array.
    per_lane_bytes = 2 * D * (p_item + t_item)
    tile_n = max(128, (VMEM_INPUT_BUDGET // per_lane_bytes) // 128 * 128)
    if max_tile_n is not None:
        tile_n = min(tile_n, max(128, (max_tile_n // 128) * 128))
    tile_n = min(tile_n, max(128, (n_arr // 128) * 128))
    grid_n = pl.cdiv(n_arr, tile_n)

    vmem_need = (2 * D * tile_n * (p_item + t_item)   # double-buffered inputs
                 + 2 * 3 * tile_n * 4                 # output buffers
                 + (2 << 20))                         # headroom / internal scratch
    vmem_limit = int(min(max(vmem_need, 16 << 20), 48 << 20))

    cost = pl.CostEstimate(
        flops=10 * N * D,
        transcendentals=4 * N,
        bytes_accessed=N * D * (p_item + t_item) + 3 * tile_n * 4,
    )

    kernel = partial(_yolo_loss_kernel, n_valid=N)
    partials = pl.pallas_call(
        kernel,
        out_shape=jax.ShapeDtypeStruct((3, tile_n), jnp.float32),
        grid=(grid_n,),
        in_specs=[
            pl.BlockSpec((D, tile_n), lambda i: (0, i)),
            pl.BlockSpec((D, tile_n), lambda i: (0, i)),
        ],
        out_specs=pl.BlockSpec((3, tile_n), lambda i: (0, 0)),
        compiler_params=pltpu.CompilerParams(
            dimension_semantics=("arbitrary",),
            vmem_limit_bytes=vmem_limit,
        ),
        cost_estimate=cost,
    )(pred_t, tgt_t)

    sums = jnp.sum(partials, axis=1)                           # (3,)
    loss_box = sums[0]
    loss_obj_noobj = sums[1]
    loss_class = sums[2]
    total = loss_box + loss_obj_noobj + loss_class
    return total, loss_box, loss_obj_noobj, loss_class


def yolo_loss_ref(prediction, targets):
    """Plain-JAX reference (same masked-sum semantics as the PyTorch module)."""
    pred = prediction.reshape(-1, prediction.shape[-1]).astype(jnp.float32)
    tgt = targets.reshape(-1, targets.shape[-1]).astype(jnp.float32)
    conf_t = tgt[:, 4:5]
    obj = (conf_t == 1.0).astype(jnp.float32)
    noobj = (conf_t == 0.0).astype(jnp.float32)

    d_xy = pred[:, 0:2] - tgt[:, 0:2]
    pred_wh = jnp.where(conf_t == 1.0, pred[:, 2:4], 0.0)
    tgt_wh = jnp.where(conf_t == 1.0, tgt[:, 2:4], 0.0)
    d_wh = jnp.sqrt(pred_wh + NOISE) - jnp.sqrt(tgt_wh)
    loss_box = LAMBDA_COORD * (jnp.sum(obj * d_xy**2) + jnp.sum(obj * d_wh**2))

    d_conf = pred[:, 4:5] - conf_t
    loss_obj_noobj = jnp.sum(obj * d_conf**2) + LAMBDA_NOOBJ * jnp.sum(noobj * d_conf**2)

    d_cls = pred[:, 5:] - tgt[:, 5:]
    loss_class = jnp.sum(obj * d_cls**2)

    total = loss_box + loss_obj_noobj + loss_class
    return total, loss_box, loss_obj_noobj, loss_class


@partial(jax.jit, static_argnames=("max_tile_n",))
def yolo_loss_pallas(prediction, targets, *, max_tile_n=None):
    """Always-Pallas path (prediction/targets: (B, S, S, 5+C) float arrays)."""
    return _yolo_loss_pallas(prediction, targets, max_tile_n=max_tile_n)


@jax.jit
def yolo_loss(prediction, targets):
    """Auto path: fused-XLA reduction for tiny inputs, Pallas kernel otherwise."""
    total_bytes = (prediction.size * prediction.dtype.itemsize
                   + targets.size * targets.dtype.itemsize)
    if total_bytes < MIN_PALLAS_BYTES:
        return yolo_loss_ref(prediction, targets)
    return _yolo_loss_pallas(prediction, targets)


if __name__ == "__main__":
    import numpy as np

    # Small synthetic YOLO-ish problem: B=2, S=13 grid, C=3 classes -> D=8.
    B, S, C = 2, 13, 3
    D = 5 + C
    key = jax.random.PRNGKey(0)
    k_pred, k_tgt, k_obj = jax.random.split(key, 3)

    # Predictions in [0, 1) so sqrt(wh + noise) is well-defined (as in a
    # sigmoid-activated YOLO head).
    prediction = jax.random.uniform(k_pred, (B, S, S, D), dtype=jnp.float32)

    # Targets: boxes/classes in [0, 1), objectness exactly 0.0 or 1.0.
    targets = jax.random.uniform(k_tgt, (B, S, S, D), dtype=jnp.float32)
    obj_flag = jax.random.bernoulli(k_obj, p=0.3, shape=(B, S, S)).astype(jnp.float32)
    targets = targets.at[:, :, :, 4].set(obj_flag)

    ref = yolo_loss_ref(prediction, targets)

    # 1) Multi-block + ragged-edge path (N = 338, tile_n = 128 -> 3 grid steps).
    out = yolo_loss_pallas(prediction, targets, max_tile_n=128)
    jax.block_until_ready(out)
    for a, b in zip(out, ref):
        np.testing.assert_allclose(np.array(a), np.array(b), rtol=1e-5, atol=1e-4)

    # 2) Default (VMEM-budget-derived) tiling path.
    out2 = yolo_loss_pallas(prediction, targets)
    jax.block_until_ready(out2)
    for a, b in zip(out2, ref):
        np.testing.assert_allclose(np.array(a), np.array(b), rtol=1e-5, atol=1e-4)

    print("KERNEL_OK")
</pallas_src>

<mosaic_0001>
module attributes {stable_mosaic.version = 11 : i64} {
  func.func @_yolo_loss_kernel(%arg0: i32, %arg1: memref<8x128xf32, #tpu.memory_space<vmem>>, %arg2: memref<8x128xf32, #tpu.memory_space<vmem>>, %arg3: memref<3x128xf32, #tpu.memory_space<vmem>>) attributes {dimension_semantics = [#tpu.dimension_semantics<arbitrary>], iteration_bounds = array<i64: 3>, scalar_prefetch = 0 : i64, scratch_operands = 0 : i64, tpu.core_type = #tpu.core_type<tc>, window_params = [{transform_indices = @transform_0, window_bounds = array<i64: 8, 128>}, {transform_indices = @transform_1, window_bounds = array<i64: 8, 128>}, {pipeline_mode = #tpu.pipeline_mode<synchronous>, transform_indices = @transform_2, window_bounds = array<i64: 3, 128>}]} {
    %c0_i32 = arith.constant 0 : i32
    %0 = arith.cmpi eq, %arg0, %c0_i32 : i32
    %1 = arith.extui %0 : i1 to i32
    %c0_i32_0 = arith.constant 0 : i32
    %2 = arith.cmpi ne, %1, %c0_i32_0 : i32
    scf.if %2 {
      %cst_25 = arith.constant 0.000000e+00 : f32
      %76 = vector.broadcast %cst_25 : f32 to vector<3x128xf32>
      %c0_26 = arith.constant 0 : index
      %c0_27 = arith.constant 0 : index
      %77 = vector.load %arg3[%c0_26, %c0_27] : memref<3x128xf32, #tpu.memory_space<vmem>>, vector<3x128xf32>
      tpu.vector_store %arg3[%c0_26, %c0_27], %76 {strides = array<i32>} : memref<3x128xf32, #tpu.memory_space<vmem>>, vector<3x128xf32>,
    } else {
    }
    %c0 = arith.constant 0 : index
    %c0_1 = arith.constant 0 : index
    %3 = vector.load %arg1[%c0, %c0_1] : memref<8x128xf32, #tpu.memory_space<vmem>>, vector<8x128xf32>
    %c0_2 = arith.constant 0 : index
    %c0_3 = arith.constant 0 : index
    %4 = vector.load %arg2[%c0_2, %c0_3] : memref<8x128xf32, #tpu.memory_space<vmem>>, vector<8x128xf32>
    %c128_i32 = arith.constant 128 : i32
    %5 = arith.muli %arg0, %c128_i32 : i32
    %6 = tpu.iota {dimensions = array<i32: 1>} : vector<1x128xi32>
    %7 = vector.broadcast %5 : i32 to vector<1x128xi32>
    %8 = arith.addi %7, %6 : vector<1x128xi32>
    %c338_i32 = arith.constant 338 : i32
    %9 = vector.broadcast %c338_i32 : i32 to vector<1x128xi32>
    %10 = arith.cmpi slt, %8, %9 : vector<1x128xi32>
    %11 = vector.extract_strided_slice %4 {offsets = [4, 0], sizes = [1, 128], strides = [1, 1]} : vector<8x128xf32> to vector<1x128xf32>
    %cst = arith.constant 1.000000e+00 : f32
    %12 = vector.broadcast %cst : f32 to vector<1x128xf32>
    %13 = arith.cmpf oeq, %11, %12 : vector<1x128xf32>
    %14 = arith.extui %13 : vector<1x128xi1> to vector<1x128xi32>
    %15 = arith.sitofp %14 : vector<1x128xi32> to vector<1x128xf32>
    %cst_4 = arith.constant 0.000000e+00 : f32
    %16 = vector.broadcast %cst_4 : f32 to vector<1x128xf32>
    %17 = arith.cmpf oeq, %11, %16 : vector<1x128xf32>
    %18 = arith.extui %17 : vector<1x128xi1> to vector<1x128xi32>
    %19 = arith.sitofp %18 : vector<1x128xi32> to vector<1x128xf32>
    %20 = arith.subf %3, %4 : vector<8x128xf32>
    %21 = arith.mulf %20, %20 : vector<8x128xf32>
    %22 = tpu.iota {dimensions = array<i32: 0>} : vector<8x1xi32>
    %c2_i32 = arith.constant 2 : i32
    %23 = vector.broadcast %c2_i32 : i32 to vector<8x1xi32>
    %24 = arith.cmpi slt, %22, %23 : vector<8x1xi32>
    %cst_5 = arith.constant 0.000000e+00 : f32
    %25 = vector.shape_cast %24 : vector<8x1xi1> to vector<8x1xi1>
    %26 = vector.broadcast %25 : vector<8x1xi1> to vector<8x128xi1>
    %27 = vector.broadcast %cst_5 : f32 to vector<8x128xf32>
    %28 = arith.select %26, %21, %27 : vector<8x128xi1>, vector<8x128xf32>
    %cst_6 = arith.constant dense<0.000000e+00> : vector<128xf32>
    %29 = vector.multi_reduction <add>, %28, %cst_6 [0] : vector<8x128xf32> to vector<128xf32>
    %30 = vector.shape_cast %29 : vector<128xf32> to vector<1x128xf32>
    %31 = vector.extract_strided_slice %3 {offsets = [2, 0], sizes = [2, 128], strides = [1, 1]} : vector<8x128xf32> to vector<2x128xf32>
    %cst_7 = arith.constant 9.99999997E-7 : f32
    %32 = vector.broadcast %cst_7 : f32 to vector<2x128xf32>
    %33 = arith.addf %31, %32 : vector<2x128xf32>
    %34 = math.sqrt %33 : vector<2x128xf32>
    %35 = vector.extract_strided_slice %4 {offsets = [2, 0], sizes = [2, 128], strides = [1, 1]} : vector<8x128xf32> to vector<2x128xf32>
    %36 = math.sqrt %35 : vector<2x128xf32>
    %37 = arith.subf %34, %36 : vector<2x128xf32>
    %cst_8 = arith.constant 0.000000e+00 : f32
    %38 = vector.shape_cast %13 : vector<1x128xi1> to vector<1x128xi1>
    %39 = vector.broadcast %38 : vector<1x128xi1> to vector<2x128xi1>
    %40 = vector.broadcast %cst_8 : f32 to vector<2x128xf32>
    %41 = arith.select %39, %37, %40 : vector<2x128xi1>, vector<2x128xf32>
    %42 = arith.mulf %41, %41 : vector<2x128xf32>
    %cst_9 = arith.constant dense<0.000000e+00> : vector<128xf32>
    %43 = vector.multi_reduction <add>, %42, %cst_9 [0] : vector<2x128xf32> to vector<128xf32>
    %44 = vector.shape_cast %43 : vector<128xf32> to vector<1x128xf32>
    %45 = arith.mulf %15, %30 : vector<1x128xf32>
    %46 = arith.addf %45, %44 : vector<1x128xf32>
    %cst_10 = arith.constant 5.000000e+00 : f32
    %47 = vector.broadcast %cst_10 : f32 to vector<1x128xf32>
    %48 = arith.mulf %47, %46 : vector<1x128xf32>
    %cst_11 = arith.constant 5.000000e-01 : f32
    %49 = vector.broadcast %cst_11 : f32 to vector<1x128xf32>
    %50 = arith.mulf %49, %19 : vector<1x128xf32>
    %51 = arith.addf %15, %50 : vector<1x128xf32>
    %52 = vector.extract_strided_slice %21 {offsets = [4, 0], sizes = [1, 128], strides = [1, 1]} : vector<8x128xf32> to vector<1x128xf32>
    %53 = arith.mulf %51, %52 : vector<1x128xf32>
    %c5_i32 = arith.constant 5 : i32
    %54 = vector.broadcast %c5_i32 : i32 to vector<8x1xi32>
    %55 = arith.cmpi sge, %22, %54 : vector<8x1xi32>
    %cst_12 = arith.constant 0.000000e+00 : f32
    %56 = vector.shape_cast %55 : vector<8x1xi1> to vector<8x1xi1>
    %57 = vector.broadcast %56 : vector<8x1xi1> to vector<8x128xi1>
    %58 = vector.broadcast %cst_12 : f32 to vector<8x128xf32>
    %59 = arith.select %57, %21, %58 : vector<8x128xi1>, vector<8x128xf32>
    %cst_13 = arith.constant dense<0.000000e+00> : vector<128xf32>
    %60 = vector.multi_reduction <add>, %59, %cst_13 [0] : vector<8x128xf32> to vector<128xf32>
    %61 = vector.shape_cast %60 : vector<128xf32> to vector<1x128xf32>
    %62 = arith.mulf %15, %61 : vector<1x128xf32>
    %cst_14 = arith.constant 0.000000e+00 : f32
    %63 = vector.broadcast %cst_14 : f32 to vector<1x128xf32>
    %c0_15 = arith.constant 0 : index
    %c0_16 = arith.constant 0 : index
    %64 = vector.load %arg3[%c0_15, %c0_16] : memref<3x128xf32, #tpu.memory_space<vmem>>, vector<1x128xf32>
    %65 = arith.select %10, %48, %63 : vector<1x128xi1>, vector<1x128xf32>
    %66 = arith.addf %64, %65 : vector<1x128xf32>
    %c0_17 = arith.constant 0 : index
    %c0_18 = arith.constant 0 : index
    %67 = vector.load %arg3[%c0_17, %c0_18] : memref<3x128xf32, #tpu.memory_space<vmem>>, vector<1x128xf32>
    tpu.vector_store %arg3[%c0_17, %c0_18], %66 {strides = array<i32>} : memref<3x128xf32, #tpu.memory_space<vmem>>, vector<1x128xf32>,
    %c1 = arith.constant 1 : index
    %c0_19 = arith.constant 0 : index
    %68 = vector.load %arg3[%c1, %c0_19] : memref<3x128xf32, #tpu.memory_space<vmem>>, vector<1x128xf32>
    %69 = arith.select %10, %53, %63 : vector<1x128xi1>, vector<1x128xf32>
    %70 = arith.addf %68, %69 : vector<1x128xf32>
    %c1_20 = arith.constant 1 : index
    %c0_21 = arith.constant 0 : index
    %71 = vector.load %arg3[%c1_20, %c0_21] : memref<3x128xf32, #tpu.memory_space<vmem>>, vector<1x128xf32>
    tpu.vector_store %arg3[%c1_20, %c0_21], %70 {strides = array<i32>} : memref<3x128xf32, #tpu.memory_space<vmem>>, vector<1x128xf32>,
    %c2 = arith.constant 2 : index
    %c0_22 = arith.constant 0 : index
    %72 = vector.load %arg3[%c2, %c0_22] : memref<3x128xf32, #tpu.memory_space<vmem>>, vector<1x128xf32>
    %73 = arith.select %10, %62, %63 : vector<1x128xi1>, vector<1x128xf32>
    %74 = arith.addf %72, %73 : vector<1x128xf32>
    %c2_23 = arith.constant 2 : index
    %c0_24 = arith.constant 0 : index
    %75 = vector.load %arg3[%c2_23, %c0_24] : memref<3x128xf32, #tpu.memory_space<vmem>>, vector<1x128xf32>
    tpu.vector_store %arg3[%c2_23, %c0_24], %74 {strides = array<i32>} : memref<3x128xf32, #tpu.memory_space<vmem>>, vector<1x128xf32>,
    return
  }
  func.func @transform_0(%arg0: i32) -> (i32, i32) {
    %c0_i32 = arith.constant 0 : i32
    %c0_i32_0 = arith.constant 0 : i32
    return %c0_i32, %arg0 : i32, i32
  }
  func.func @transform_1(%arg0: i32) -> (i32, i32) {
    %c0_i32 = arith.constant 0 : i32
    %c0_i32_0 = arith.constant 0 : i32
    return %c0_i32, %arg0 : i32, i32
  }
  func.func @transform_2(%arg0: i32) -> (i32, i32) {
    %c0_i32 = arith.constant 0 : i32
    %c0_i32_0 = arith.constant 0 : i32
    %c0_i32_1 = arith.constant 0 : i32
    return %c0_i32, %c0_i32_0 : i32, i32
  }
}

</mosaic_0001>

<bundles_post_ra>
// kernel: yolo_loss_pallas.1
= control target key start
LH: loop header
LB: loop body
LE: loop exit
PB: predicated region body
PF: predicated region fallthrough
CT: control target
= control target key end

     0   :  { %s348_s9 = smov 0   ;;  %s423_s0 = inlined_call_operand.vmem [shape: f32[8,338], index: 0, kind: input, shape index: {}]   ;;  %s424_s1 = inlined_call_operand.vmem [shape: f32[8,338], index: 1, kind: input, shape index: {}]   ;;  %s425_s2 = inlined_call_operand.vmem [shape: f32[3,128], index: 2, kind: output, shape index: {}]  }
   0x1 LB: > { %s295_s10 = sadd.s32 4294967295, %s328_s9   ;;  %p298_p0 = scmp.ge.s32.totalorder %s328_s9, 1  ;;  %s328_s9 = sphi %s348_s9, %s12_s9  }
   0x2   : > { %p115_p1 = scmp.lt.s32.totalorder %s328_s9, 4 }
   0x4   : > { %p116_p2 = pnand %p298_p0, %p115_p1 }
   0x5   : > { %p135_p3 = scmp.lt.s32.totalorder (!%p116_p2), %s295_s10, 2  ;;  %p301_p4 = scmp.ne.s32.totalorder (!%p116_p2), %s295_s10, 0 }
   0x6   : > { %119 = sbr.rel (%p116_p2) target bundleno = 73 (0x49), region = 28 }
   0xb   : > { %s136_s11 = scalar_select %p135_p3, %s295_s10, 2 }
   0xc   : > { %146 = sbr.rel (%p301_p4) target bundleno = 19 (0x13), region = 32 }
   0xd   : > { %s299_s12 = sshll.u32 %s136_s11, 3 }
   0xe   : > { %s138_s15 = scalar_lea.vmem %s423_s0, %s299_s12  ;;  %s142_s18 = scalar_lea.vmem %s424_s1, %s299_s12 }
  0x11   : > { %v330_v0 = vmov 0.0  }
  0x12   : > { %147 = vst [vmem:[%s425_s2] sm:$0x7] %v330_v0 }
  0x13 PF: > { %v148_v1 = vld [vmem:[%s138_s15] sm:$0xff]  ;;  %v151_v3 = vlaneseq  ;;  %s302_s21 = sshll.u32 %s295_s10, 7  ;;  %v331_v16 = vmov 0.0   ;;  %v332_v32 = vmov 0   ;;  %vm209_vm9 = vcmask 1041408  }
  0x14   : > { %v365_v2 = vld [vmem:[%s142_s18] sm:$0xff]  ;;  %v368_v5 = vadd.f32 1e-06, %v148_v1  ;;  %v153_v9 = vstv %s302_s21 }
  0x15   : > { %v162_v4 = vsub.f32 %v148_v1, %v365_v2  ;;  %318 = vrsqrt.f32 %v365_v2  ;;  %v165_v6 = vshrl.u32 %v151_v3, 7  ;;  %v152_v8 = vand.u32 127, %v151_v3 }
  0x16   : > { %320 = vrsqrt.f32 %v368_v5  ;;  %vm159_vm1 = vcmp.eq.f32.partialorder %v365_v2, 0.0  ;;  %vm156_vm2 = vcmp.eq.f32.partialorder %v365_v2, 1.0  ;;  %vm196_vm5 = vcmp.eq.f32.partialorder %v365_v2, inf }
  0x17   : > { %v163_v7 = vmul.f32 %v162_v4, %v162_v4  ;;  %vm223_vm0 = vcmp.ge.s32.totalorder %v165_v6, 5  ;;  %v374_v15 = vadd.s32 %v153_v9, %v152_v8  ;;  %v304_v17 = vsel %vm159_vm1, 1.0, %v331_v16 }
  0x18   : > { %vm166_vm3 = vcmp.lt.s32.totalorder %v165_v6, 2  ;;  %v220_v21 = vmul.f32 0.5, %v304_v17  ;;  %v303_v22 = vsel %vm156_vm2, 1.0, %v331_v16  ;;  %v157_v33 = vsel %vm156_vm2, 1, %v332_v32 }
  0x19   : > { %v226_v10 = vsel %vm223_vm0, %v163_v7, 0.0  ;;  %vm155_vm4 = vcmp.lt.s32.totalorder %v374_v15, 338  ;;  %v169_v27 = vsel %vm166_vm3, %v163_v7, 0.0  ;;  %v199_v39 = vand.u32 2147483648, %v365_v2  ;;  %v241_v45 = vld [vmem:[%s425_s2 + $0x1] sm:$0x1] }
  0x1a   : > { %v227_v12 = vrot.slane %v226_v10, 4  ;;  %v221_v26 = vadd.f32 %v303_v22, %v220_v21  ;;  %v170_v35 = vrot.slane %v169_v27, 4  ;;  %v202_v44 = vperm.slane %v157_v33, 4  ;;  %v248_v53 = vld [vmem:[%s425_s2 + $0x2] sm:$0x1] }
  0x1b   : > { %v319_v11 = vpop.eup %318  ;;  %vm184_vm6 = vcmp.eq.f32.partialorder %v368_v5, inf  ;;  %v187_v46 = vand.u32 2147483648, %v368_v5  ;;  %vm186_vm7 = vcmp.eq.f32.partialorder %v368_v5, 0.0 }
  0x1c   : > { %v190_v13 = vmul.f32 %v319_v11, %v365_v2  ;;  %v321_v14 = vpop.eup %320  ;;  %v228_v18 = vadd.f32 %v227_v12, %v226_v10  ;;  %v222_v31 = vmul.f32 %v221_v26, %v163_v7  ;;  %v171_v49 = vadd.f32 %v170_v35, %v169_v27 }
  0x1d   : > { %v178_v19 = vmul.f32 %v321_v14, %v368_v5  ;;  %vm203_vm8 = vcmp.eq.s32.totalorder %v202_v44, 1 }
  0x1e   : > { %v191_v20 = vmul.f32 %v319_v11, %v190_v13  ;;  %v229_v23 = vrot.slane %v228_v18, 2  ;;  %v242_v38 = vsel %vm155_vm4, %v222_v31, 0.0  ;;  %v172_v58 = vrot.slane %v171_v49, 2  ;;  %v234_v13 = vld [vmem:[%s425_s2] sm:$0x1] }
  0x1f   : > { %v179_v24 = vmul.f32 %v321_v14, %v178_v19  ;;  %v244_v40 = vrot.slane %v242_v38, 4 }
  0x20   : > { %v192_v25 = vmul.f32 0.5, %v191_v20  ;;  %v230_v28 = vadd.f32 %v229_v23, %v228_v18  ;;  %v173_v63 = vadd.f32 %v172_v58, %v171_v49 }
  0x21   : > { %v180_v29 = vmul.f32 0.5, %v179_v24  ;;  %v246_v47 = vadd.f32 %v244_v40, %v241_v45 }
  0x22   : > { %v193_v30 = vsub.f32 1.5, %v192_v25  ;;  %v231_v34 = vrot.slane %v230_v28, 1 }
  0x23   : > { %v181_v36 = vsub.f32 1.5, %v180_v29  ;;  %247 = vst [vmem:[%s425_s2 + $0x1] sm:$0x1] %v246_v47 }
  0x24   : > { %v194_v37 = vmul.f32 %v319_v11, %v193_v30  ;;  %v232_v41 = vadd.f32 %v231_v34, %v230_v28 }
  0x25   : > { %v182_v42 = vmul.f32 %v321_v14, %v181_v36 }
  0x26   : > { %v195_v43 = vmul.f32 %v194_v37, %v365_v2  ;;  %v233_v48 = vmul.f32 %v303_v22, %v232_v41 }
  0x27   : > { %v183_v50 = vmul.f32 %v182_v42, %v368_v5 }
  0x28   : > { %v197_v51 = vsel %vm196_vm5, %v365_v2, %v195_v43  ;;  %v249_v54 = vsel %vm155_vm4, %v233_v48, 0.0  ;;  %v174_v2 = vrot.slane %v173_v63, 1 }
  0x29   : > { %v200_v52 = vsel %vm159_vm1, %v199_v39, %v197_v51  ;;  %v185_v55 = vsel %vm184_vm6, %v368_v5, %v183_v50  ;;  %v251_v56 = vrot.slane %v249_v54, 4 }
  0x2a   : > { %v188_v57 = vsel %vm186_vm7, %v187_v46, %v185_v55  ;;  %v175_v5 = vadd.f32 %v174_v2, %v173_v63 }
  0x2b   : > { %v201_v59 = vsub.f32 %v188_v57, %v200_v52  ;;  %v253_v60 = vadd.f32 %v251_v56, %v248_v53 }
  0x2c   : > { %v217_v9 = vmul.f32 %v303_v22, %v175_v5 }
  0x2d   : > { %v204_v61 = vsel %vm203_vm8, %v201_v59, 0.0  ;;  %254 = vst [vmem:[%s425_s2 + $0x2] sm:$0x1] %v253_v60 }
  0x2e   : > { %v205_v62 = vmul.f32 %v204_v61, %v204_v61 }
  0x30   : > { %v207_v0 = vrot.slane %v205_v62, 2 }
  0x32   : > { %v210_v1 = vsel %vm209_vm9, %v207_v0, 0.0 }
  0x33   : > { %v211_v3 = vrot.slane %v210_v1, 4 }
  0x35   : > { %v212_v4 = vadd.f32 %v211_v3, %v210_v1 }
  0x37   : > { %v213_v6 = vrot.slane %v212_v4, 2 }
  0x39   : > { %v214_v7 = vadd.f32 %v213_v6, %v212_v4 }
  0x3b   : > { %v215_v8 = vrot.slane %v214_v7, 1 }
  0x3d   : > { %v216_v10 = vadd.f32 %v215_v8, %v214_v7 }
  0x3f   : > { %v218_v11 = vadd.f32 %v217_v9, %v216_v10 }
  0x41   : > { %v219_v12 = vmul.f32 5.0, %v218_v11 }
  0x43   : > { %v235_v14 = vsel %vm155_vm4, %v219_v12, 0.0 }
  0x44   : > { %v237_v16 = vrot.slane %v235_v14, 4 }
  0x46   : > { %v239_v17 = vadd.f32 %v237_v16, %v234_v13 }
  0x48   : > { %240 = vst [vmem:[%s425_s2] sm:$0x1] %v239_v17 }
  0x49 PF: > { %s12_s9 = sadd.s32 1, %s328_s9  }
  0x4a   : > { %p9_p5 = scmp.ge.s32.totalorder %s12_s9, 5  }
  0x4c   :  { %11 = sbr.rel (!%p9_p5) target bundleno = 1 (0x1), region = 61 }

</bundles_post_ra>
